<compile_context>
chip_gen: v7x
topology: tpu7x:2x2x1
jax: 0.10.0
libtpu: 0.0.40
codegen_flags: <defaults>
</compile_context>

<pallas_src>
import math

import jax
import jax.numpy as jnp
from jax.experimental import pallas as pl
from jax.experimental.pallas import tpu as pltpu


_LAYER_SIZES = [(17, 64), (64, 32), (32, 16), (16, 1)]     # (fan_in, fan_out)
_FLOPS_PER_ROW = 2 * sum(fi * fo for fi, fo in _LAYER_SIZES)


def _round_up(n, m):
    return ((n + m - 1) // m) * m


def _choose_tile(B, tb):
    """Pad B to a multiple of 128 and pick a 128-aligned batch tile TB that divides
    B_pad exactly; prefer >= 2 tiles (v7x 2-TC split) and tiles no larger than tb."""
    B_pad = _round_up(B, 128)
    m = B_pad // 128                           # number of 128-lane groups
    max_groups = max(min(tb // 128, m), 1)     # tile-size cap, in groups
    min_tiles = -(-m // max_groups)            # ceil(m / max_groups)
    if m >= 2:
        min_tiles = max(min_tiles, 2)          # keep both TCs busy on v7x
    n_tiles = min_tiles
    while m % n_tiles:                         # smallest divisor of m >= min_tiles
        n_tiles += 1
    TB = (m // n_tiles) * 128
    return B_pad, TB, n_tiles


def _mlp_kernel(x_ref,
                w1_ref, b1_ref,
                w2_ref, b2_ref,
                w3_ref, b3_ref,
                w4_ref, b4_ref,
                out_ref):
    # x_ref: (17, TB) bf16, batch on the lane axis.
    # Layer 1: (64,17)bf16 @ (17,TB)bf16 -> (64,TB) f32, +bias (64,1), ReLU.   (MXU)
    h = jnp.dot(w1_ref[...], x_ref[...], preferred_element_type=jnp.float32)
    h = jnp.maximum(h + b1_ref[...], 0.0)
    # Layer 2: (32,64) @ (64,TB) -> (32,TB); bf16 activation for full MXU rate.
    h = jnp.dot(w2_ref[...], h.astype(jnp.bfloat16),
                preferred_element_type=jnp.float32)
    h = jnp.maximum(h + b2_ref[...], 0.0)
    # Layer 3: (16,32) @ (32,TB) -> (16,TB).
    h = jnp.dot(w3_ref[...], h.astype(jnp.bfloat16),
                preferred_element_type=jnp.float32)
    h = jnp.maximum(h + b3_ref[...], 0.0)
    # Layer 4 (16 -> 1): VPU mul with the (16,1) f32 weight column broadcast across
    # lanes, then a 16-sublane reduce (XLU) -> lane-dense (1, TB) row, +bias.
    y = jnp.sum(h * w4_ref[...], axis=0, keepdims=True) + b4_ref[...]    # (1, TB) f32
    out_ref[...] = y.astype(out_ref.dtype)


def neural_network2_forward(x, params, *, tb=2048):
    """x: (B, 17) float32. params: PyTorch-layout weights (out, in) and biases (out,).
    Returns (B,) float32 == NeuralNetwork2.forward(x)."""
    B = x.shape[0]
    B_pad, TB, n_tiles = _choose_tile(B, tb)

    # Single fused wrapper pass: bf16 cast + transpose to batch-in-lanes (+ pad).
    x_t = x.astype(jnp.bfloat16).T                      # (17, B)
    if B_pad != B:
        x_t = jnp.pad(x_t, ((0, 0), (0, B_pad - B)))    # (17, B_pad)

    args = (
        x_t,
        params["w1"].astype(jnp.bfloat16), params["b1"].astype(jnp.float32).reshape(-1, 1),
        params["w2"].astype(jnp.bfloat16), params["b2"].astype(jnp.float32).reshape(-1, 1),
        params["w3"].astype(jnp.bfloat16), params["b3"].astype(jnp.float32).reshape(-1, 1),
        params["w4"].astype(jnp.float32).reshape(-1, 1),   # (16, 1), stays f32 (VPU path)
        params["b4"].astype(jnp.float32).reshape(1, 1),
    )

    def const_spec(a):
        # Same block every grid step -> stays resident in VMEM, DMA'd once.
        return pl.BlockSpec(a.shape, lambda i: (0, 0))

    in_specs = [pl.BlockSpec((17, TB), lambda i: (0, i))]
    in_specs += [const_spec(a) for a in args[1:]]
    out_specs = pl.BlockSpec((1, TB), lambda i: (0, i))

    param_bytes = sum(int(a.size) * a.dtype.itemsize for a in args[1:])
    cost = pl.CostEstimate(
        flops=_FLOPS_PER_ROW * B_pad,
        transcendentals=0,
        bytes_accessed=17 * B_pad * 2 + B_pad * 4 + param_bytes,
    )

    out = pl.pallas_call(
        _mlp_kernel,
        out_shape=jax.ShapeDtypeStruct((1, B_pad), jnp.float32),
        grid=(n_tiles,),
        in_specs=in_specs,
        out_specs=out_specs,
        compiler_params=pltpu.CompilerParams(dimension_semantics=("parallel",)),
        cost_estimate=cost,
    )(*args)

    # x[:, 0] from the PyTorch forward: take the lane-dense row, drop the padding.
    return out[0, :B]


def init_params(key):
    """PyTorch-style init: U(-1/sqrt(fan_in), 1/sqrt(fan_in)).
    Weights stored PyTorch-style as (out_features, in_features); biases as (out,)."""
    params = {}
    keys = jax.random.split(key, 2 * len(_LAYER_SIZES))
    for i, (fan_in, fan_out) in enumerate(_LAYER_SIZES):
        bound = 1.0 / math.sqrt(fan_in)
        params[f"w{i+1}"] = jax.random.uniform(
            keys[2 * i], (fan_out, fan_in), jnp.float32, -bound, bound)
        params[f"b{i+1}"] = jax.random.uniform(
            keys[2 * i + 1], (fan_out,), jnp.float32, -bound, bound)
    return params


def _reference_forward(x, params):
    # Pure-JAX reference with the same numerics as the kernel: bf16 x / W1-3,
    # bf16 activations feeding layers 2-3, f32 accumulation + bias + ReLU, f32 layer 4.
    h = x.astype(jnp.bfloat16)
    a = None
    for i in (1, 2, 3):
        w = params[f"w{i}"].astype(jnp.bfloat16)            # (out, in)
        a = jnp.dot(h, w.T, preferred_element_type=jnp.float32) + params[f"b{i}"]
        a = jnp.maximum(a, 0.0)
        h = a.astype(jnp.bfloat16)
    y = jnp.sum(a * params["w4"][0], axis=-1) + params["b4"][0]
    return y


if __name__ == "__main__":
    key = jax.random.PRNGKey(0)
    pkey, xkey = jax.random.split(key)
    params = init_params(pkey)

    # (B=8 -> single 128-row tile) and (B=300, tb=128 -> 3-tile grid with tail padding).
    for B, tb in ((8, 2048), (300, 128)):
        x = jax.random.normal(jax.random.fold_in(xkey, B), (B, 17), jnp.float32)
        y = jax.block_until_ready(neural_network2_forward(x, params, tb=tb))
        y_ref = _reference_forward(x, params)
        assert y.shape == (B,)
        err = float(jnp.max(jnp.abs(y - y_ref)))
        assert jnp.allclose(y, y_ref, atol=3e-3, rtol=3e-3), err

    print("KERNEL_OK")
</pallas_src>

<mosaic_0001>
module attributes {stable_mosaic.version = 11 : i64} {
  func.func @_mlp_kernel(%arg0: i32, %arg1: memref<17x128xbf16, #tpu.memory_space<vmem>>, %arg2: memref<64x17xbf16, #tpu.memory_space<vmem>>, %arg3: memref<64x1xf32, #tpu.memory_space<vmem>>, %arg4: memref<32x64xbf16, #tpu.memory_space<vmem>>, %arg5: memref<32x1xf32, #tpu.memory_space<vmem>>, %arg6: memref<16x32xbf16, #tpu.memory_space<vmem>>, %arg7: memref<16x1xf32, #tpu.memory_space<vmem>>, %arg8: memref<16x1xf32, #tpu.memory_space<vmem>>, %arg9: memref<1x1xf32, #tpu.memory_space<vmem>>, %arg10: memref<1x128xf32, #tpu.memory_space<vmem>>) attributes {dimension_semantics = [#tpu.dimension_semantics<parallel>], iteration_bounds = array<i64: 1>, scalar_prefetch = 0 : i64, scratch_operands = 0 : i64, tpu.core_type = #tpu.core_type<tc>, window_params = [{transform_indices = @transform_0, window_bounds = array<i64: 17, 128>}, {pipeline_mode = #tpu.pipeline_mode<synchronous>, transform_indices = @transform_1, window_bounds = array<i64: 64, 17>}, {pipeline_mode = #tpu.pipeline_mode<synchronous>, transform_indices = @transform_2, window_bounds = array<i64: 64, 1>}, {pipeline_mode = #tpu.pipeline_mode<synchronous>, transform_indices = @transform_3, window_bounds = array<i64: 32, 64>}, {pipeline_mode = #tpu.pipeline_mode<synchronous>, transform_indices = @transform_4, window_bounds = array<i64: 32, 1>}, {pipeline_mode = #tpu.pipeline_mode<synchronous>, transform_indices = @transform_5, window_bounds = array<i64: 16, 32>}, {pipeline_mode = #tpu.pipeline_mode<synchronous>, transform_indices = @transform_6, window_bounds = array<i64: 16, 1>}, {pipeline_mode = #tpu.pipeline_mode<synchronous>, transform_indices = @transform_7, window_bounds = array<i64: 16, 1>}, {pipeline_mode = #tpu.pipeline_mode<synchronous>, transform_indices = @transform_8, window_bounds = array<i64: 1, 1>}, {transform_indices = @transform_9, window_bounds = array<i64: 1, 128>}]} {
    %c0 = arith.constant 0 : index
    %c0_0 = arith.constant 0 : index
    %0 = vector.load %arg2[%c0, %c0_0] : memref<64x17xbf16, #tpu.memory_space<vmem>>, vector<64x17xbf16>
    %c0_1 = arith.constant 0 : index
    %c0_2 = arith.constant 0 : index
    %1 = vector.load %arg1[%c0_1, %c0_2] : memref<17x128xbf16, #tpu.memory_space<vmem>>, vector<17x128xbf16>
    %cst = arith.constant dense<0.000000e+00> : vector<64x128xf32>
    %2 = tpu.matmul %0, %1, %cst {dimension_numbers = #tpu.dot_dimension_numbers<[1], [0], [0], [1], [0, 0, 1, 1], [], []>} : vector<64x17xbf16>, vector<17x128xbf16>, vector<64x128xf32> -> vector<64x128xf32>
    %c0_3 = arith.constant 0 : index
    %c0_4 = arith.constant 0 : index
    %3 = vector.load %arg3[%c0_3, %c0_4] : memref<64x1xf32, #tpu.memory_space<vmem>>, vector<64x1xf32>
    %4 = vector.broadcast %3 : vector<64x1xf32> to vector<64x128xf32>
    %5 = arith.addf %2, %4 : vector<64x128xf32>
    %cst_5 = arith.constant 0.000000e+00 : f32
    %6 = vector.broadcast %cst_5 : f32 to vector<64x128xf32>
    %7 = arith.maximumf %5, %6 : vector<64x128xf32>
    %c0_6 = arith.constant 0 : index
    %c0_7 = arith.constant 0 : index
    %8 = vector.load %arg4[%c0_6, %c0_7] : memref<32x64xbf16, #tpu.memory_space<vmem>>, vector<32x64xbf16>
    %9 = arith.truncf %7 : vector<64x128xf32> to vector<64x128xbf16>
    %cst_8 = arith.constant dense<0.000000e+00> : vector<32x128xf32>
    %10 = tpu.matmul %8, %9, %cst_8 {dimension_numbers = #tpu.dot_dimension_numbers<[1], [0], [0], [1], [0, 0, 1, 1], [], []>} : vector<32x64xbf16>, vector<64x128xbf16>, vector<32x128xf32> -> vector<32x128xf32>
    %c0_9 = arith.constant 0 : index
    %c0_10 = arith.constant 0 : index
    %11 = vector.load %arg5[%c0_9, %c0_10] : memref<32x1xf32, #tpu.memory_space<vmem>>, vector<32x1xf32>
    %12 = vector.broadcast %11 : vector<32x1xf32> to vector<32x128xf32>
    %13 = arith.addf %10, %12 : vector<32x128xf32>
    %cst_11 = arith.constant 0.000000e+00 : f32
    %14 = vector.broadcast %cst_11 : f32 to vector<32x128xf32>
    %15 = arith.maximumf %13, %14 : vector<32x128xf32>
    %c0_12 = arith.constant 0 : index
    %c0_13 = arith.constant 0 : index
    %16 = vector.load %arg6[%c0_12, %c0_13] : memref<16x32xbf16, #tpu.memory_space<vmem>>, vector<16x32xbf16>
    %17 = arith.truncf %15 : vector<32x128xf32> to vector<32x128xbf16>
    %cst_14 = arith.constant dense<0.000000e+00> : vector<16x128xf32>
    %18 = tpu.matmul %16, %17, %cst_14 {dimension_numbers = #tpu.dot_dimension_numbers<[1], [0], [0], [1], [0, 0, 1, 1], [], []>} : vector<16x32xbf16>, vector<32x128xbf16>, vector<16x128xf32> -> vector<16x128xf32>
    %c0_15 = arith.constant 0 : index
    %c0_16 = arith.constant 0 : index
    %19 = vector.load %arg7[%c0_15, %c0_16] : memref<16x1xf32, #tpu.memory_space<vmem>>, vector<16x1xf32>
    %20 = vector.broadcast %19 : vector<16x1xf32> to vector<16x128xf32>
    %21 = arith.addf %18, %20 : vector<16x128xf32>
    %cst_17 = arith.constant 0.000000e+00 : f32
    %22 = vector.broadcast %cst_17 : f32 to vector<16x128xf32>
    %23 = arith.maximumf %21, %22 : vector<16x128xf32>
    %c0_18 = arith.constant 0 : index
    %c0_19 = arith.constant 0 : index
    %24 = vector.load %arg8[%c0_18, %c0_19] : memref<16x1xf32, #tpu.memory_space<vmem>>, vector<16x1xf32>
    %25 = vector.broadcast %24 : vector<16x1xf32> to vector<16x128xf32>
    %26 = arith.mulf %23, %25 : vector<16x128xf32>
    %cst_20 = arith.constant dense<0.000000e+00> : vector<128xf32>
    %27 = vector.multi_reduction <add>, %26, %cst_20 [0] : vector<16x128xf32> to vector<128xf32>
    %28 = vector.shape_cast %27 : vector<128xf32> to vector<1x128xf32>
    %c0_21 = arith.constant 0 : index
    %c0_22 = arith.constant 0 : index
    %29 = vector.load %arg9[%c0_21, %c0_22] : memref<1x1xf32, #tpu.memory_space<vmem>>, vector<1x1xf32>
    %30 = vector.broadcast %29 : vector<1x1xf32> to vector<1x128xf32>
    %31 = arith.addf %28, %30 : vector<1x128xf32>
    %c0_23 = arith.constant 0 : index
    %c0_24 = arith.constant 0 : index
    %32 = vector.load %arg10[%c0_23, %c0_24] : memref<1x128xf32, #tpu.memory_space<vmem>>, vector<1x128xf32>
    tpu.vector_store %arg10[%c0_23, %c0_24], %31 {strides = array<i32>} : memref<1x128xf32, #tpu.memory_space<vmem>>, vector<1x128xf32>,
    return
  }
  func.func @transform_0(%arg0: i32) -> (i32, i32) {
    %c0_i32 = arith.constant 0 : i32
    %c0_i32_0 = arith.constant 0 : i32
    return %c0_i32, %arg0 : i32, i32
  }
  func.func @transform_1(%arg0: i32) -> (i32, i32) {
    %c0_i32 = arith.constant 0 : i32
    %c0_i32_0 = arith.constant 0 : i32
    %c0_i32_1 = arith.constant 0 : i32
    return %c0_i32, %c0_i32_0 : i32, i32
  }
  func.func @transform_2(%arg0: i32) -> (i32, i32) {
    %c0_i32 = arith.constant 0 : i32
    %c0_i32_0 = arith.constant 0 : i32
    %c0_i32_1 = arith.constant 0 : i32
    return %c0_i32, %c0_i32_0 : i32, i32
  }
  func.func @transform_3(%arg0: i32) -> (i32, i32) {
    %c0_i32 = arith.constant 0 : i32
    %c0_i32_0 = arith.constant 0 : i32
    %c0_i32_1 = arith.constant 0 : i32
    return %c0_i32, %c0_i32_0 : i32, i32
  }
  func.func @transform_4(%arg0: i32) -> (i32, i32) {
    %c0_i32 = arith.constant 0 : i32
    %c0_i32_0 = arith.constant 0 : i32
    %c0_i32_1 = arith.constant 0 : i32
    return %c0_i32, %c0_i32_0 : i32, i32
  }
  func.func @transform_5(%arg0: i32) -> (i32, i32) {
    %c0_i32 = arith.constant 0 : i32
    %c0_i32_0 = arith.constant 0 : i32
    %c0_i32_1 = arith.constant 0 : i32
    return %c0_i32, %c0_i32_0 : i32, i32
  }
  func.func @transform_6(%arg0: i32) -> (i32, i32) {
    %c0_i32 = arith.constant 0 : i32
    %c0_i32_0 = arith.constant 0 : i32
    %c0_i32_1 = arith.constant 0 : i32
    return %c0_i32, %c0_i32_0 : i32, i32
  }
  func.func @transform_7(%arg0: i32) -> (i32, i32) {
    %c0_i32 = arith.constant 0 : i32
    %c0_i32_0 = arith.constant 0 : i32
    %c0_i32_1 = arith.constant 0 : i32
    return %c0_i32, %c0_i32_0 : i32, i32
  }
  func.func @transform_8(%arg0: i32) -> (i32, i32) {
    %c0_i32 = arith.constant 0 : i32
    %c0_i32_0 = arith.constant 0 : i32
    %c0_i32_1 = arith.constant 0 : i32
    return %c0_i32, %c0_i32_0 : i32, i32
  }
  func.func @transform_9(%arg0: i32) -> (i32, i32) {
    %c0_i32 = arith.constant 0 : i32
    %c0_i32_0 = arith.constant 0 : i32
    return %c0_i32, %arg0 : i32, i32
  }
}

</mosaic_0001>

<bundles_post_ra>
// kernel: tpu_custom_call.1
= control target key start
LH: loop header
LB: loop body
LE: loop exit
PB: predicated region body
PF: predicated region fallthrough
CT: control target
= control target key end

     0   :  { %s685_s0 = inlined_call_operand.vmem [shape: bf16[17,128], index: 0, kind: input, shape index: {}]   ;;  %s686_s1 = inlined_call_operand.vmem [shape: bf16[64,17], index: 1, kind: input, shape index: {}]   ;;  %s687_s2 = inlined_call_operand.vmem [shape: f32[64,1], index: 2, kind: input, shape index: {}]   ;;  %s688_s3 = inlined_call_operand.vmem [shape: bf16[32,64], index: 3, kind: input, shape index: {}]   ;;  %s689_s4 = inlined_call_operand.vmem [shape: f32[32,1], index: 4, kind: input, shape index: {}]   ;;  %s690_s5 = inlined_call_operand.vmem [shape: bf16[16,32], index: 5, kind: input, shape index: {}]   ;;  %s691_s6 = inlined_call_operand.vmem [shape: f32[16,1], index: 6, kind: input, shape index: {}]   ;;  %s692_s7 = inlined_call_operand.vmem [shape: f32[16,1], index: 7, kind: input, shape index: {}]   ;;  %s693_s8 = inlined_call_operand.<no memory space> [shape: f32[1,1], index: 8, kind: input, shape index: {}]   ;;  %s694_s9 = inlined_call_operand.hbm [shape: f32[1,128], index: 9, kind: output, shape index: {}]  }
   0x1   :  { %v14_v0 = vstv %s693_s8 }
   0x2   :  { %15 = vst [vmem:[#allocation2] sm:$0x1] %v14_v0 }
   0x3   :  { %v502_v1 = vld [vmem:[%s685_s0] sm:$0xff]   ;;  %v503_v2 = vld [vmem:[%s685_s0 + $0x8] ss:$0 sps:$4 sm:$0x11]   ;;  %vm137_vm0 = vcmask 1040384   ;;  %v535_v3 = vmov 0  }
   0x4   :  { %500 = vset.pattern.permute.xlu0 %v535_v3  ;;  %501 = vset.pattern.permute.xlu1 %v535_v3  ;;  %v139_v4 = vsel %vm137_vm0, 65535, %v535_v3  ;;  %v504_v5 = vld [vmem:[%s686_s1] sm:$0xff]   ;;  %vm124_vm1 = vcmask 138240   ;;  %v505_v7 = vld [vmem:[%s686_s1 + $0x8] sm:$0xff]   ;;  %v49_v9 = vld [vmem:[%s687_s2 + $0x10] sm:$0xff] }
   0x5   :  { %464 = vmatprep.subr.bf16.mxu0 %v502_v1  ;;  %v141_v6 = vand.u32 %v503_v2, %v139_v4  ;;  %468 = vmatprep.mubr.msk.bf16.mxu0 %vm124_vm1, %v504_v5  ;;  %v47_v8 = vld [vmem:[%s687_s2] sm:$0xff]  ;;  %v506_v10 = vld [vmem:[%s686_s1 + $0x10] sm:$0xff]   ;;  %v48_v11 = vld [vmem:[%s687_s2 + $0x8] sm:$0xff] }
   0x6   :  { %465 = vmatpush3.bf16.msra.mxu0 %v502_v1  ;;  %57 = vperm.xlu0 %500, %v47_v8   ;;  %v50_v12 = vld [vmem:[%s687_s2 + $0x18] sm:$0xff]  ;;  %v51_v13 = vld [vmem:[%s687_s2 + $0x20] sm:$0xff]  ;;  %v52_v14 = vld [vmem:[%s687_s2 + $0x28] sm:$0xff] }
   0x7   :  { %466 = vmatprep.subr.bf16.mxu0 %v141_v6  ;;  %67 = vperm.xlu1 %501, %v49_v9  }
   0xa   :  { %467 = vmatpush3.bf16.msra.mxu0 %v141_v6  ;;  %62 = vperm.xlu0 %500, %v48_v11  }
   0xb   :  { %72 = vperm.xlu1 %501, %v50_v12  }
   0xd   :  { %469 = vmatmul.mubr.msk.bf16.vlgmr.msra.gmra.mrb[0].mxu0 %vm124_vm1, %v505_v7 }
   0xe   :  { %472 = vmatprep.mubr.msk.bf16.mxu0 %vm124_vm1, %v506_v10 }
   0xf   :  { %16 = vsyncpa [#allocation4], 0  ;;  %v507_v15 = vld [vmem:[%s686_s1 + $0x18] sm:$0xff]   ;;  %77 = vperm.xlu0 %500, %v51_v13   ;;  %v53_v16 = vld [vmem:[%s687_s2 + $0x30] sm:$0xff]  ;;  %82 = vperm.xlu1 %501, %v52_v14   ;;  %vm258_vm2 = vcmask 523264   ;;  %v536_v1 = vmov 0.0  }
  0x10   :  { %v54_v17 = vld [vmem:[%s687_s2 + $0x38] sm:$0xff]  ;;  %v224_v18 = vld [vmem:[%s689_s4] sm:$0xff]  ;;  %v225_v19 = vld [vmem:[%s689_s4 + $0x8] sm:$0xff]  ;;  %488 = vmatprep.subr.bf16.mxu0 %v536_v1  ;;  %vm537_vm3 = vmmov 0   ;;  %vm339_vm4 = vcmask 261120  }
  0x11   :  { %v226_v20 = vld [vmem:[%s689_s4 + $0x10] sm:$0xff]  ;;  %v227_v21 = vld [vmem:[%s689_s4 + $0x18] sm:$0xff]  ;;  %v322_v22 = vld [vmem:[%s691_s6] sm:$0xff] }
  0x12   :  { %v323_v23 = vld [vmem:[%s691_s6 + $0x8] sm:$0xff]  ;;  %v386_v24 = vld [vmem:[%s692_s7] sm:$0xff] }
  0x13   :  { %87 = vperm.xlu0 %500, %v53_v16   ;;  %92 = vperm.xlu1 %501, %v54_v17   ;;  %v387_v25 = vld [vmem:[%s692_s7 + $0x8] sm:$0xff]  ;;  %v407_v26 = vld [vmem:[#allocation2] sm:$0x1] }
  0x14   :  { %v508_v27 = vld [vmem:[%s688_s3] sm:$0xff]   ;;  %v509_v0 = vld [vmem:[%s688_s3 + $0x8] sm:$0xff]  }
  0x15   :  { %473 = vmatmul.mubr.msk.bf16.gmra.mrb[4].mxu0 %vm124_vm1, %v507_v15  ;;  %484 = vmatprep.mubr.msk.bf16.mxu1 %vm258_vm2, %v508_v27 }
  0x16   :  { %492 = vmatprep.mubr.msk.bf16.mxu0 %vm537_vm3, %v536_v1 }
  0x17   :  { %230 = vperm.xlu0 %500, %v224_v18   ;;  %235 = vperm.xlu1 %501, %v225_v19  }
  0x1b   :  { %240 = vperm.xlu0 %500, %v226_v20   ;;  %245 = vperm.xlu1 %501, %v227_v21   ;;  %v510_v20 = vld [vmem:[%s690_s5] sm:$0xff]   ;;  %s538_s5 = smov [#allocation3]  }
  0x1c   :  { %s425_s30 = sshll.u32 %s538_s5, 4  ;;  %s426_s30 = int_to_ptr.vmem [resolvable:$true] %s425_s30 }
  0x1d   :  { %s511_s10 = scalar_lea.vmem %s426_s30, 16  ;;  %s515_s11 = scalar_lea.vmem %s426_s30, 32 }
  0x1e   :  { %p512_p0 = scmp.ne.s32.totalorder %s426_s30, %s511_s10  ;;  %p516_p1 = scmp.lt.s32.totalorder %s426_s30, %s426_s30 }
  0x1f   :  { %326 = vperm.xlu0 %500, %v322_v22   ;;  %331 = vperm.xlu1 %501, %v323_v23   ;;  %p517_p2 = scmp.lt.s32.totalorder %s515_s11, %s511_s10 }
  0x21   :  { %p518_p3 = por %p517_p2, %p516_p1 }
  0x23   :  { %390 = vperm.xlu0 %500, %v386_v24   ;;  %395 = vperm.xlu1 %501, %v387_v25   ;;  %p519_p4 = pnand %p518_p3, %p512_p0 }
  0x27   :  { %410 = vperm.xlu0 %500, %v407_v26  }
  0x85   :  { %v58_v28 = vpop.permute.xlu0 %57 }
  0x86   :  { %v68_v29 = vpop.permute.xlu1 %67 }
  0x89   :  { %v63_v30 = vpop.permute.xlu0 %62 }
  0x8a   :  { %v73_v31 = vpop.permute.xlu1 %72 }
  0x8e   :  { %v78_v35 = vpop.permute.xlu0 %77  ;;  %v83_v40 = vpop.permute.xlu1 %82 }
  0x92   :  { %v88_v47 = vpop.permute.xlu0 %87  ;;  %v93_v52 = vpop.permute.xlu1 %92 }
  0x96   :  { %v231_v2 = vpop.permute.xlu0 %230  ;;  %v236_v3 = vpop.permute.xlu1 %235 }
  0x9a   :  { %v241_v4 = vpop.permute.xlu0 %240  ;;  %v246_v8 = vpop.permute.xlu1 %245 }
  0x9e   :  { %v327_v21 = vpop.permute.xlu0 %326  ;;  %v332_v22 = vpop.permute.xlu1 %331 }
  0xe0   :  { %v470_v32 = vpop.f32.mrb[0].mxu0 }
  0xe1   :  { %v186_v33 = vadd.f32 %v470_v32, %v68_v29  ;;  %v177_v34 = vpop.f32.mrb[1].mxu0  ;;  %v396_v32 = vpop.permute.xlu1 %395 }
  0xe2   :  { %v178_v36 = vadd.f32 %v177_v34, %v58_v28  ;;  %v471_v37 = vpop.f32.mrb[2].mxu0 }
  0xe3   :  { %v189_v38 = vadd.f32 %v471_v37, %v73_v31  ;;  %v180_v39 = vpop.f32.mrb[3].mxu0  ;;  %v210_v42 = vmax.f32 %v186_v33, 0.0  ;;  %v391_v31 = vpop.permute.xlu0 %390 }
  0xe4   :  { %v181_v41 = vadd.f32 %v180_v39, %v63_v30  ;;  %v208_v44 = vmax.f32 %v178_v36, 0.0 }
  0xe5   :  { %v211_v43 = vmax.f32 %v189_v38, 0.0 }
  0xe6   :  { %v209_v45 = vmax.f32 %v181_v41, 0.0 }
  0xe7   :  { %v221_v46 = vpack.c.bf16 %v211_v43, %v210_v42  ;;  %v411_v43 = vpop.permute.xlu0 %410 }
  0xe8   :  { %v474_v48 = vpop.f32.mrb[4].mxu0  ;;  %v220_v49 = vpack.c.bf16 %v209_v45, %v208_v44 }
  0xe9   :  { %v202_v50 = vadd.f32 %v474_v48, %v88_v47  ;;  %v193_v51 = vpop.f32.mrb[5].mxu0 }
  0xea   :  { %v194_v53 = vadd.f32 %v193_v51, %v78_v35  ;;  %v475_v54 = vpop.f32.mrb[6].mxu0  ;;  %476 = vmatprep.subr.bf16.mxu1 %v220_v49  ;;  %v413_v35 = vlaneseq }
  0xeb   :  { %v205_v55 = vadd.f32 %v475_v54, %v93_v52  ;;  %v196_v56 = vpop.f32.mrb[7].mxu0  ;;  %477 = vmatpush3.bf16.msra.mxu1 %v220_v49  ;;  %v214_v58 = vmax.f32 %v202_v50, 0.0 }
  0xec   :  { %v197_v57 = vadd.f32 %v196_v56, %v83_v40  ;;  %478 = vmatprep.subr.bf16.mxu1 %v221_v46  ;;  %v212_v60 = vmax.f32 %v194_v53, 0.0  ;;  %v414_v38 = vshrl.u32 %v413_v35, 7 }
  0xed   :  { %v215_v59 = vmax.f32 %v205_v55, 0.0 }
  0xee   :  { %v213_v61 = vmax.f32 %v197_v57, 0.0  ;;  %v415_v41 = vsub.s32 0, %v414_v38 }
  0xef   :  { %v223_v62 = vpack.c.bf16 %v215_v59, %v214_v58  ;;  %479 = vmatpush3.bf16.msra.mxu1 %v221_v46 }
  0xf0   :  { %v222_v63 = vpack.c.bf16 %v213_v61, %v212_v60  ;;  %v416_v45 = vrot.slane %v411_v43, %v415_v41 }
  0xf2   :  { %480 = vmatprep.subr.bf16.mxu1 %v222_v63 }
  0xf3   :  { %481 = vmatpush3.bf16.msra.mxu1 %v222_v63 }
  0xf4   :  { %482 = vmatprep.subr.bf16.mxu1 %v223_v62 }
  0xf7   :  { %483 = vmatpush3.bf16.msra.mxu1 %v223_v62 }
  0xfa   :  { %485 = vmatmul.mubr.msk.bf16.vlgmr.msra.gmra.mrb[0].mxu1 %vm258_vm2, %v509_v0 }
 0x1cd   :  { %v486_v5 = vpop.f32.mrb[0].mxu1 }
 0x1ce   :  { %v308_v6 = vadd.f32 %v486_v5, %v241_v4  ;;  %v299_v7 = vpop.f32.mrb[1].mxu1 }
 0x1cf   :  { %v300_v9 = vadd.f32 %v299_v7, %v231_v2  ;;  %v487_v10 = vpop.f32.mrb[2].mxu1 }
 0x1d0   :  { %v311_v11 = vadd.f32 %v487_v10, %v246_v8  ;;  %v302_v12 = vpop.f32.mrb[3].mxu1  ;;  %v316_v14 = vmax.f32 %v308_v6, 0.0 }
 0x1d1   :  { %v303_v13 = vadd.f32 %v302_v12, %v236_v3  ;;  %v314_v16 = vmax.f32 %v300_v9, 0.0 }
 0x1d2   :  { %v317_v15 = vmax.f32 %v311_v11, 0.0 }
 0x1d3   :  { %v315_v17 = vmax.f32 %v303_v13, 0.0 }
 0x1d4   :  { %v321_v18 = vpack.c.bf16 %v317_v15, %v316_v14 }
 0x1d5   :  { %v320_v19 = vpack.c.bf16 %v315_v17, %v314_v16 }
 0x1d7   :  { %489 = vmatpush3.bf16.msra.mxu0 %v320_v19 }
 0x1d8   :  { %490 = vmatprep.subr.bf16.mxu0 %v536_v1 }
 0x1db   :  { %491 = vmatpush3.bf16.msra.mxu0 %v321_v18 }
 0x1de   :  { %493 = vmatmul.mubr.msk.bf16.vlgmr.msra.gmra.mrb[8].mxu0 %vm339_vm4, %v510_v20 }
 0x2b1   :  { %v377_v23 = vpop.f32.mrb[8].mxu0 }
 0x2b2   :  { %v378_v24 = vadd.f32 %v377_v23, %v327_v21  ;;  %v494_v25 = vpop.f32.mrb[9].mxu0 }
 0x2b3   :  { %v380_v26 = vpop.f32.mrb[10].mxu0 }
 0x2b4   :  { %v384_v27 = vmax.f32 %v378_v24, 0.0  ;;  %v381_v28 = vadd.f32 %v380_v26, %v332_v22  ;;  %v495_v29 = vpop.f32.mrb[11].mxu0 }
 0x2b6   :  { %v385_v30 = vmax.f32 %v381_v28, 0.0  ;;  %v398_v33 = vmul.f32 %v391_v31, %v384_v27 }
 0x2b8   :  { %v399_v34 = vmul.f32 %v396_v32, %v385_v30 }
 0x2ba   :  { %v400_v36 = vadd.f32 %v399_v34, %v398_v33 }
 0x2bc   :  { %v401_v37 = vrot.slane %v400_v36, 4 }
 0x2be   :  { %v402_v39 = vadd.f32 %v401_v37, %v400_v36 }
 0x2c0   :  { %v403_v40 = vrot.slane %v402_v39, 2 }
 0x2c2   :  { %v404_v42 = vadd.f32 %v403_v40, %v402_v39 }
 0x2c4   :  { %v405_v44 = vrot.slane %v404_v42, 1 }
 0x2c6   :  { %v406_v46 = vadd.f32 %v405_v44, %v404_v42 }
 0x2c8   :  { %v417_v47 = vadd.f32 %v416_v45, %v406_v46 }
 0x2ca   :  { %418 = vst [vmem:[#allocation3] sm:$0x1] %v417_v47 }
 0x2cb   :  { %522 = shalt.err (!%p519_p4)
}
 0x2cc   :  { %s523_s14 = scalar_lea.hbm %s694_s9, 16 }
 0x2cd   :  { %p524_p5 = scmp.ne.s32.totalorder %s694_s9, %s523_s14  ;;  %p527_p6 = scmp.lt.u32.totalorder %s523_s14, %s694_s9 }
 0x2cf   :  { %p529_p7 = pnand %p527_p6, %p524_p5 }
 0x2d1   :  { %532 = shalt.err (!%p529_p7)
}
 0x2d2   :  { %428 = dma.vmem_to_hbm [thread:$0]  %s426_s30, 16, %s694_s9, [#allocation4]  }
 0x2d3   :  { %533 = dma.done.wait [#allocation4], 16  }
 0x2d4   :  { %534 = vsyncadd [#allocation4], 4294967280 }
 0x2d5   :  { %432 = vsyncpa [#allocation4], 1 }

</bundles_post_ra>
